<compile_context>
chip_gen: v7x
topology: tpu7x:2x2x1
jax: 0.10.0
libtpu: 0.0.40
codegen_flags: <defaults>
</compile_context>

<pallas_src>
import jax
import jax.numpy as jnp
from jax.experimental import pallas as pl
from jax.experimental.pallas import tpu as pltpu

# ---- VPODE hyper-parameters (module defaults) --------------------------------
BETA_0 = 0.1    # beta_min
BETA_1 = 20.0   # beta_max

# ---- problem sizes (small, synthetic, lane-dense) -----------------------------
B = 8     # batch of latents z
D = 128   # latent dimension  (multiple of 128 -> lane-dense stores / matmuls)
H = 128   # ccf hidden width  (multiple of 128)
C = 10    # number of classes
S = 16    # number of fused drift evaluations (ODE steps) per pallas_call


def vpode_kernel(scale_ref, z_ref, w2y_ref, w1_ref, b1_ref, out_ref):
    """One ODE-step drift evaluation per grid point.

    scale_ref : SMEM (S,)      f32 -- precomputed -0.5 * beta_t per step
    z_ref     : VMEM (1, B, D) f32 -- latent states of this step
    w2y_ref   : VMEM (B, H)    f32 -- W2[:, y_i] rows  (resident across steps)
    w1_ref    : VMEM (D, H)    f32 -- (resident across steps)
    b1_ref    : VMEM (1, H)    f32 -- (resident across steps)
    out_ref   : VMEM (1, B, D) f32 -- dz/dt of this step
    """
    s = pl.program_id(0)
    scale = scale_ref[s]                                       # -0.5 * beta_t

    z = z_ref[0]                                               # (B, D)
    h = jnp.tanh(
        jnp.dot(z, w1_ref[...], preferred_element_type=jnp.float32)
        + b1_ref[...])                                         # (B, H)
    grad_h = (1.0 - h * h) * w2y_ref[...]                      # (B, H)
    # dE/dz = grad_h @ W1^T : contract W1 on its H axis (no transposed copy).
    grad_z = jax.lax.dot_general(
        grad_h, w1_ref[...],
        dimension_numbers=(((1,), (1,)), ((), ())),
        preferred_element_type=jnp.float32)                    # (B, D)
    out_ref[0] = (scale * grad_z).astype(out_ref.dtype)


@jax.jit
def vpode_forward_steps(t_ks, zs, y, w1, b1, w2):
    """Fused drift evaluation for a whole trajectory.

    t_ks : (S,)        ODE times
    zs   : (S, B, D)   latent states per step
    Returns dz_dt : (S, B, D)
    """
    n_steps = t_ks.shape[0]
    # All glue lives inside the same jit as the pallas_call.
    scales = -0.5 * (BETA_0 + t_ks.astype(jnp.float32) * (BETA_1 - BETA_0))  # (S,)
    w2y = w2.T[y]                                   # (B, H) gather, step-invariant
    b1_2d = b1.reshape(1, H)

    return pl.pallas_call(
        vpode_kernel,
        out_shape=jax.ShapeDtypeStruct((n_steps, B, D), jnp.float32),
        grid=(n_steps,),
        in_specs=[
            pl.BlockSpec(memory_space=pltpu.SMEM),              # scales (whole array)
            pl.BlockSpec((1, B, D), lambda s: (s, 0, 0)),       # zs: one step per block
            pl.BlockSpec((B, H), lambda s: (0, 0)),             # w2y (resident)
            pl.BlockSpec((D, H), lambda s: (0, 0)),             # W1  (resident)
            pl.BlockSpec((1, H), lambda s: (0, 0)),             # b1  (resident)
        ],
        out_specs=pl.BlockSpec((1, B, D), lambda s: (s, 0, 0)),
        compiler_params=pltpu.CompilerParams(
            dimension_semantics=("parallel",)),   # independent steps -> v7x megacore
    )(scales, zs, w2y, w1, b1_2d)


def vpode_forward(t_k, states, y, w1, b1, w2):
    """Module-equivalent single drift evaluation: forward(t_k, states) -> (dz_dt,)."""
    z = states[0]
    t_arr = jnp.reshape(jnp.asarray(t_k, jnp.float32), (1,))
    dz_dt = vpode_forward_steps(t_arr, z[None], y, w1, b1, w2)[0]
    return (dz_dt,)


# ---- pure-JAX reference (autograd over the same ccf), for verification --------
def _cond_energy_sum(z, yoh, w1, b1, w2):
    h = jnp.tanh(z @ w1 + b1)            # (B, H)
    logits = h @ w2                      # (B, C)
    return jnp.sum(logits * yoh)         # sum_i logits[i, y_i]


def vpode_reference_steps(t_ks, zs, y, w1, b1, w2):
    yoh = jax.nn.one_hot(y, C, dtype=jnp.float32)
    beta_t = BETA_0 + t_ks * (BETA_1 - BETA_0)                            # (S,)
    grads = jax.vmap(
        lambda z: jax.grad(_cond_energy_sum)(z, yoh, w1, b1, w2))(zs)     # (S,B,D)
    return -0.5 * beta_t[:, None, None] * grads


if __name__ == "__main__":
    key = jax.random.PRNGKey(0)
    kz, ky, kw1, kb1, kw2 = jax.random.split(key, 5)

    # deterministic synthetic parameters of the ccf (classifier energy model)
    w1 = jax.random.normal(kw1, (D, H), jnp.float32) / jnp.sqrt(D)
    b1 = jax.random.normal(kb1, (H,), jnp.float32) * 0.01
    w2 = jax.random.normal(kw2, (H, C), jnp.float32) / jnp.sqrt(H)

    # a trajectory of (t_k, z_k) drift-evaluation points
    y = jax.random.randint(ky, (B,), 0, C)
    zs = jax.random.normal(kz, (S, B, D), jnp.float32)
    t_ks = jnp.linspace(1.0, 1e-3, S, dtype=jnp.float32)

    # fused multi-step evaluation (one pallas_call, weights resident in VMEM)
    dz = jax.block_until_ready(vpode_forward_steps(t_ks, zs, y, w1, b1, w2))
    ref = jax.block_until_ready(vpode_reference_steps(t_ks, zs, y, w1, b1, w2))
    assert dz.shape == (S, B, D)
    assert jnp.allclose(dz, ref, atol=1e-4, rtol=1e-4)

    # module-equivalent single evaluation: forward(t_k, states) -> (dz_dt,)
    (dz_single,) = vpode_forward(t_ks[3], (zs[3],), y, w1, b1, w2)
    dz_single = jax.block_until_ready(dz_single)
    assert dz_single.shape == (B, D)
    assert jnp.allclose(dz_single, ref[3], atol=1e-4, rtol=1e-4)

    print("KERNEL_OK")
</pallas_src>

<mosaic_0001>
module attributes {stable_mosaic.version = 11 : i64} {
  func.func @vpode_kernel(%arg0: i32, %arg1: memref<16xf32, #tpu.memory_space<smem>>, %arg2: memref<1x8x128xf32, #tpu.memory_space<vmem>>, %arg3: memref<8x128xf32, #tpu.memory_space<vmem>>, %arg4: memref<128x128xf32, #tpu.memory_space<vmem>>, %arg5: memref<1x128xf32, #tpu.memory_space<vmem>>, %arg6: memref<1x8x128xf32, #tpu.memory_space<vmem>>) attributes {dimension_semantics = [#tpu.dimension_semantics<parallel>], iteration_bounds = array<i64: 16>, scalar_prefetch = 0 : i64, scratch_operands = 0 : i64, tpu.core_type = #tpu.core_type<tc>, window_params = [{transform_indices = @transform_0, window_bounds = array<i64: 16>}, {transform_indices = @transform_1, window_bounds = array<i64: 1, 8, 128>}, {pipeline_mode = #tpu.pipeline_mode<synchronous>, transform_indices = @transform_2, window_bounds = array<i64: 8, 128>}, {pipeline_mode = #tpu.pipeline_mode<synchronous>, transform_indices = @transform_3, window_bounds = array<i64: 128, 128>}, {pipeline_mode = #tpu.pipeline_mode<synchronous>, transform_indices = @transform_4, window_bounds = array<i64: 1, 128>}, {transform_indices = @transform_5, window_bounds = array<i64: 1, 8, 128>}]} {
    %0 = arith.index_cast %arg0 : i32 to index
    %1 = memref.load %arg1[%0] : memref<16xf32, #tpu.memory_space<smem>>
    %c0 = arith.constant 0 : index
    %c0_0 = arith.constant 0 : index
    %c0_1 = arith.constant 0 : index
    %2 = vector.load %arg2[%c0, %c0_0, %c0_1] : memref<1x8x128xf32, #tpu.memory_space<vmem>>, vector<1x8x128xf32>
    %3 = vector.shape_cast %2 : vector<1x8x128xf32> to vector<8x128xf32>
    %c0_2 = arith.constant 0 : index
    %c0_3 = arith.constant 0 : index
    %4 = vector.load %arg4[%c0_2, %c0_3] : memref<128x128xf32, #tpu.memory_space<vmem>>, vector<128x128xf32>
    %cst = arith.constant dense<0.000000e+00> : vector<8x128xf32>
    %5 = tpu.matmul %3, %4, %cst {dimension_numbers = #tpu.dot_dimension_numbers<[1], [0], [0], [1], [0, 0, 1, 1], [], []>} : vector<8x128xf32>, vector<128x128xf32>, vector<8x128xf32> -> vector<8x128xf32>
    %c0_4 = arith.constant 0 : index
    %c0_5 = arith.constant 0 : index
    %6 = vector.load %arg5[%c0_4, %c0_5] : memref<1x128xf32, #tpu.memory_space<vmem>>, vector<1x128xf32>
    %7 = vector.broadcast %6 : vector<1x128xf32> to vector<8x128xf32>
    %8 = arith.addf %5, %7 : vector<8x128xf32>
    %9 = math.tanh %8 : vector<8x128xf32>
    %10 = arith.mulf %9, %9 : vector<8x128xf32>
    %cst_6 = arith.constant 1.000000e+00 : f32
    %11 = vector.broadcast %cst_6 : f32 to vector<8x128xf32>
    %12 = arith.subf %11, %10 : vector<8x128xf32>
    %c0_7 = arith.constant 0 : index
    %c0_8 = arith.constant 0 : index
    %13 = vector.load %arg3[%c0_7, %c0_8] : memref<8x128xf32, #tpu.memory_space<vmem>>, vector<8x128xf32>
    %14 = arith.mulf %12, %13 : vector<8x128xf32>
    %c0_9 = arith.constant 0 : index
    %c0_10 = arith.constant 0 : index
    %15 = vector.load %arg4[%c0_9, %c0_10] : memref<128x128xf32, #tpu.memory_space<vmem>>, vector<128x128xf32>
    %cst_11 = arith.constant dense<0.000000e+00> : vector<8x128xf32>
    %16 = tpu.matmul %14, %15, %cst_11 {dimension_numbers = #tpu.dot_dimension_numbers<[1], [1], [0], [0], [0, 0, 1, 0], [], []>} : vector<8x128xf32>, vector<128x128xf32>, vector<8x128xf32> -> vector<8x128xf32>
    %17 = vector.broadcast %1 : f32 to vector<8x128xf32>
    %18 = arith.mulf %17, %16 : vector<8x128xf32>
    %c0_12 = arith.constant 0 : index
    %c0_13 = arith.constant 0 : index
    %c0_14 = arith.constant 0 : index
    %19 = vector.load %arg6[%c0_12, %c0_13, %c0_14] : memref<1x8x128xf32, #tpu.memory_space<vmem>>, vector<1x8x128xf32>
    %20 = vector.shape_cast %19 : vector<1x8x128xf32> to vector<8x128xf32>
    %21 = vector.shape_cast %18 : vector<8x128xf32> to vector<1x8x128xf32>
    tpu.vector_store %arg6[%c0_12, %c0_13, %c0_14], %21 {strides = array<i32>} : memref<1x8x128xf32, #tpu.memory_space<vmem>>, vector<1x8x128xf32>,
    return
  }
  func.func @transform_0(%arg0: i32) -> i32 {
    %c0_i32 = arith.constant 0 : i32
    %c0_i32_0 = arith.constant 0 : i32
    return %c0_i32 : i32
  }
  func.func @transform_1(%arg0: i32) -> (i32, i32, i32) {
    %c0_i32 = arith.constant 0 : i32
    %c0_i32_0 = arith.constant 0 : i32
    %c0_i32_1 = arith.constant 0 : i32
    return %arg0, %c0_i32, %c0_i32_0 : i32, i32, i32
  }
  func.func @transform_2(%arg0: i32) -> (i32, i32) {
    %c0_i32 = arith.constant 0 : i32
    %c0_i32_0 = arith.constant 0 : i32
    %c0_i32_1 = arith.constant 0 : i32
    return %c0_i32, %c0_i32_0 : i32, i32
  }
  func.func @transform_3(%arg0: i32) -> (i32, i32) {
    %c0_i32 = arith.constant 0 : i32
    %c0_i32_0 = arith.constant 0 : i32
    %c0_i32_1 = arith.constant 0 : i32
    return %c0_i32, %c0_i32_0 : i32, i32
  }
  func.func @transform_4(%arg0: i32) -> (i32, i32) {
    %c0_i32 = arith.constant 0 : i32
    %c0_i32_0 = arith.constant 0 : i32
    %c0_i32_1 = arith.constant 0 : i32
    return %c0_i32, %c0_i32_0 : i32, i32
  }
  func.func @transform_5(%arg0: i32) -> (i32, i32, i32) {
    %c0_i32 = arith.constant 0 : i32
    %c0_i32_0 = arith.constant 0 : i32
    %c0_i32_1 = arith.constant 0 : i32
    return %arg0, %c0_i32, %c0_i32_0 : i32, i32, i32
  }
}

</mosaic_0001>

<bundles_post_ra>
// kernel: vpode_forward_steps.1
= control target key start
LH: loop header
LB: loop body
LE: loop exit
PB: predicated region body
PF: predicated region fallthrough
CT: control target
= control target key end

     0   :  { %10 = vsyncpa [#allocation5], 0  ;;  %s1205_s0 = inlined_call_operand.vmem [shape: f32[16], index: 0, kind: input, shape index: {}]   ;;  %s1206_s1 = inlined_call_operand.hbm [shape: f32[16,8,128], index: 1, kind: input, shape index: {}]   ;;  %s1207_s2 = inlined_call_operand.vmem [shape: f32[8,128], index: 2, kind: input, shape index: {}]   ;;  %s1208_s3 = inlined_call_operand.hbm [shape: f32[128,128], index: 3, kind: input, shape index: {}]   ;;  %s1209_s4 = inlined_call_operand.vmem [shape: f32[1,128], index: 4, kind: input, shape index: {}]   ;;  %s1210_s5 = inlined_call_operand.hbm [shape: f32[16,8,128], index: 5, kind: output, shape index: {}]  }
   0x1   :  { %11 = vsyncpa [#allocation3], 0 }
   0x2   :  { %13 = vsyncpa [#allocation3 + $0x1], 0 }
   0x3   :  { %14 = vsyncpa [#allocation8], 0 }
   0x4   :  { %15 = vsyncpa [#allocation4], 0 }
   0x5   :  { %17 = vsyncpa [#allocation4 + $0x1], 0  ;;  %s979_s18 = smov 0   ;;  %s981_s19 = smov 0  }
   0x6   :  { %s983_s20 = smov 0   ;;  %s985_s21 = smov 0  }
   0x7 LB: > { %s1000_s22 = sadd.s32 4294967295, %s938_s21   ;;  %s548_s23 = sadd.s32 4294967294, %s938_s21   ;;  %s938_s21 = sphi %s985_s21, %s1231_s21   ;;  %s934_s20 = sphi %s983_s20, %s1230_s20   ;;  %s930_s19 = sphi %s981_s19, %s1229_s19   ;;  %s926_s18 = sphi %s979_s18, %s1228_s18  }
   0x8   : > { %p64_p0 = scmp.ne.s32.totalorder %s930_s19, %s926_s18  ;;  %p1211_p1 = scmp.eq.s32.totalorder %s1000_s22, 0 }
   0x9   : > { %p157_p3 = scmp.eq.s32.totalorder %s548_s23, 15  ;;  %p549_p5 = scmp.ge.s32.totalorder %s938_s21, 1 }
   0xa   : > { %p1009_p4 = por %p1211_p1, %p64_p0  ;;  %p164_p7 = scmp.lt.s32.totalorder %s938_s21, 17 }
   0xb   : > { %p1014_p6 = por %p157_p3, %p64_p0  ;;  %s177_s28 = sshll.u32 %s1205_s0, 4  ;;  %s178_s28 = int_to_ptr.vmem [resolvable:$true] %s177_s28 }
   0xc   : > { %s1214_s24 = scalar_select %p1009_p4, 1, 0 }
   0xd   : > { %s1215_s25 = scalar_select %p1014_p6, 1, 0 }
   0xe   : > { %p1022_p8 = pnand %p549_p5, %p164_p7  ;;  %s940_s30 = smov [#allocation7]  }
   0xf   : > { %s190_s6 = sshll.u32 %s940_s30, 4  ;;  %s791_s8 = scalar_lea.vmem %s178_s28, 16  ;;  %s1034_s6 = int_to_ptr.vmem [resolvable:$true] %s190_s6 }
  0x10   : > { %p729_p9 = pneg %p1022_p8  ;;  %p792_p11 = scmp.ne.s32.totalorder %s178_s28, %s791_s8 }
  0x11   : > { %p799_p3 = scmp.lt.s32.totalorder %s178_s28, %s178_s28  ;;  %p800_p5 = scmp.lt.s32.totalorder %s791_s8, %s791_s8 }
  0x12   : > { %p1030_p10 = pnand %p729_p9, %p1211_p1 }
  0x13   : > { %p801_p7 = por %p800_p5, %p799_p3 }
  0x14   : > { %p793_p12 = pneg %p1030_p10 }
  0x16   : > { %p794_p13 = pnand %p793_p12, %p792_p11 }
  0x18   : > { %p795_p0 = pneg %p794_p13 }
  0x1a   : > { %p802_p2 = pnand %p801_p7, %p795_p0 }
  0x1c   : > { %805 = shalt.err (!%p802_p2)
}
  0x1d   : > { %s941_s9 = smov [#allocation2]   ;;  %s806_s12 = scalar_lea.hbm %s1208_s3, 2048 }
  0x1e   : > { %732 = dma.vmem_to_smem (!%p1030_p10), %s178_s28, 16, %s941_s9, [#allocation5]  }
  0x1f   : > { %p807_p9 = scmp.ne.s32.totalorder %s1208_s3, %s806_s12  ;;  %p813_p2 = scmp.lt.u32.totalorder %s806_s12, %s1208_s3 }
  0x21   : > { %p809_p11 = pnand %p807_p9, %p793_p12 }
  0x23   : > { %p810_p13 = pneg %p809_p11 }
  0x25   : > { %p815_p0 = pnand %p813_p2, %p810_p13 }
  0x27   : > { %818 = shalt.err (!%p815_p0)
}
  0x28   : > { %s819_s17 = scalar_lea.vmem %s1034_s6, 2048  ;;  %p827_p1 = scmp.lt.s32.totalorder %s1034_s6, %s1034_s6 }
  0x29   : > { %p820_p3 = scmp.ne.s32.totalorder %s1034_s6, %s819_s17  ;;  %p828_p9 = scmp.lt.s32.totalorder %s819_s17, %s819_s17 }
  0x2b   : > { %p822_p5 = pnand %p820_p3, %p793_p12  ;;  %p829_p11 = por %p828_p9, %p827_p1 }
  0x2d   : > { %p823_p7 = pneg %p822_p5 }
  0x2f   : > { %p830_p6 = pnand %p829_p11, %p823_p7 }
  0x31   : > { %833 = shalt.err (!%p830_p6)
}
  0x32   : > { %s942_s23 = smov 128   ;;  %s943_s26 = smov 8  }
  0x33   : > { %735 = dma.hbm_to_vmem [thread:$0]  (!%p1030_p10), %s1208_s3, 2048, %s1034_s6, [#allocation8], %s942_s23, %s942_s23, %s943_s26  }
  0x34   : > { %s1069_s30 = sadd.s32 1, %s938_s21   ;;  %s51_s8 = sadd.s32 1, %s934_s20 }
  0x35   : > { %s48_s9 = ssub.s32 %s938_s21, %s1069_s30  ;;  %p58_p1 = scmp.ne.s32.totalorder %s934_s20, %s930_s19 }
  0x36   : > { %p49_p6 = scmp.eq.s32.totalorder %s48_s9, 0  ;;  %p59_p12 = scmp.eq.s32.totalorder %s938_s21, 0 }
  0x37   : > { %p1218_p13 = scmp.eq.s32.totalorder %s1000_s22, 15  ;;  %p746_p0 = scmp.lt.s32.totalorder %s938_s21, 16 }
  0x38   : > { %s1085_s11 = scalar_select %p49_p6, %s934_s20, %s51_s8  }
  0x39   : > { %p1079_p2 = por %p1218_p13, %p58_p1  ;;  %p60_p3 = por %p59_p12, %p58_p1 }
  0x3a   : > { %s207_s7 = sand.u32 1, %s934_s20   ;;  %s554_s6 = sshll.u32 %s938_s21, 7 }
  0x3b   : > { %s1219_s10 = scalar_select %p1079_p2, 1, 0 }
  0x3c   : > { %s553_s12 = sshll.u32 %s207_s7, 3  ;;  %s1092_s15 = scalar_lea.hbm %s1206_s1, %s554_s6 }
  0x3d   : > { %s211_s16 = scalar_lea.vmem [#allocation6], %s553_s12  ;;  %p1096_p10 = pnand %p746_p0, %p60_p3 }
  0x3e   : > { %s218_s17 = sshll.u32 %s211_s16, 4  ;;  %s208_s26 = scalar_lea.sflag [#allocation3], %s207_s7  ;;  %s1094_s17 = int_to_ptr.vmem [resolvable:$true] %s218_s17 }
  0x3f   : > { %s834_s27 = scalar_lea.hbm %s1092_s15, 128  ;;  %p836_p7 = pneg %p1096_p10 }
  0x40   : > { %p835_p5 = scmp.ne.s32.totalorder %s1092_s15, %s834_s27  ;;  %s839_s9 = scalar_lea.hbm %s1206_s1, 2048 }
  0x41   : > { %p840_p1 = scmp.lt.u32.totalorder %s1092_s15, %s1206_s1  ;;  %p841_p6 = scmp.lt.u32.totalorder %s839_s9, %s834_s27 }
  0x42   : > { %p837_p9 = pnand %p836_p7, %p835_p5  ;;  %p843_p13 = scmp.lt.u32.totalorder %s834_s27, %s1092_s15 }
  0x43   : > { %p842_p12 = por %p841_p6, %p840_p1 }
  0x44   : > { %p838_p11 = pneg %p837_p9 }
  0x45   : > { %p844_p0 = por %p843_p13, %p842_p12 }
  0x47   : > { %p845_p3 = pnand %p844_p0, %p838_p11 }
  0x49   : > { %848 = shalt.err (!%p845_p3)
}
  0x4a   : > { %s849_s7 = scalar_lea.vmem %s1094_s17, 128  ;;  %s944_s13 = smov [#allocation6]  }
  0x4b   : > { %p850_p5 = scmp.ne.s32.totalorder %s1094_s17, %s849_s7  ;;  %s854_s14 = sshll.u32 %s944_s13, 4  ;;  %s855_s14 = int_to_ptr.vmem [resolvable:$false] %s854_s14 }
  0x4c   : > { %s856_s16 = scalar_lea.vmem %s855_s14, 256  ;;  %p857_p4 = scmp.lt.s32.totalorder %s1094_s17, %s855_s14 }
  0x4d   : > { %p852_p9 = pnand %p850_p5, %p836_p7  ;;  %p858_p1 = scmp.lt.s32.totalorder %s856_s16, %s849_s7 }
  0x4f   : > { %p853_p2 = pneg %p852_p9  ;;  %p859_p6 = por %p858_p1, %p857_p4 }
  0x51   : > { %p860_p12 = pnand %p859_p6, %p853_p2 }
  0x53   : > { %863 = shalt.err (!%p860_p12)
}
  0x54   : > { %739 = dma.hbm_to_vmem [thread:$0]  (!%p1096_p10), %s1092_s15, 128, %s1094_s17, %s208_s26  }
  0x55   : > { %227 = sbr.rel (%p1022_p8) target bundleno = 595 (0x253), region = 40  ;;  %p1221_p7 = scmp.eq.s32.totalorder (!%p1022_p8), %s1000_s22, 0 }
  0x5c   : > { %909 = dma.done.wait (%p1221_p7), [#allocation5], 16   ;;  %p1222_p11 = pmov %p1221_p7 }
  0x5d   : > { %s1132_s27 = sand.u32 1, %s930_s19   ;;  %p1223_p4 = scmp.ne.s32.totalorder %s1214_s24, 0 }
  0x5e   : > { %911 = vsyncadd (%p1222_p11), [#allocation5], 4294967280  ;;  %s557_s23 = sshll.u32 %s1132_s27, 3  ;;  %s234_s28 = scalar_lea.sflag [#allocation3], %s1132_s27 }
  0x5f   : > { %s1138_s15 = scalar_lea.vmem [#allocation6], %s557_s23 }
  0x60   : > { %913 = dma.done.wait (%p1223_p4), %s234_s28, 128  }
  0x61   : > { %915 = vsyncadd (%p1223_p4), %s234_s28, 4294967168  ;;  %p1224_p8 = pmov %p1221_p7 }
  0x62   : > { %p1225_p2 = pmov %p1221_p7 }
  0x63   : > { %917 = dma.done.wait (%p1224_p8), [#allocation8], 2048  }
  0x64   : > { %919 = vsyncadd (%p1225_p2), [#allocation8], 4294965248 }
  0x65   : > { %246 = sfence }
  0x66   : > { %v271_v0 = vld [vmem:[#allocation7] sm:$0xff]  ;;  %v272_v1 = vld [vmem:[#allocation7 + $0x8] sm:$0xff]  ;;  %v273_v2 = vld [vmem:[#allocation7 + $0x10] sm:$0xff]  ;;  %v945_v3 = vmov 0.0|0.0   ;;  %vm946_vm0 = vmmov 0   ;;  %v947_v6 = vmov 0.0  }
  0x67   : > { %669 = vmatprep.subr.bf16.mxu0 %v945_v3  ;;  %v670_v4 = vpack.c.bf16 %v272_v1, %v271_v0  ;;  %v274_v5 = vld [vmem:[#allocation7 + $0x18] sm:$0xff]  ;;  %631 = vmatprep.mubr.msk.f32.mxu0 %vm946_vm0, %v947_v6  ;;  %v275_v8 = vld [vmem:[#allocation7 + $0x20] sm:$0xff]  ;;  %v276_v9 = vld [vmem:[#allocation7 + $0x28] sm:$0xff]  ;;  %s269_s8 = sld [smem:[#allocation2 + %s1000_s22]]  ;;  %s562_s9 = sshll.u32 %s1000_s22, 7 }
  0x68   : > { %693 = vmatprep.subr.bf16.mxu1 %v945_v3  ;;  %666 = vmatprep.mubr.msk.f32.mxu1 %vm946_vm0, %v947_v6  ;;  %v673_v7 = vpack.c.bf16 %v274_v5, %v273_v2  ;;  %v676_v10 = vpack.c.bf16 %v276_v9, %v275_v8  ;;  %v277_v11 = vld [vmem:[#allocation7 + $0x30] sm:$0xff]  ;;  %v278_v12 = vld [vmem:[#allocation7 + $0x38] sm:$0xff]  ;;  %v279_v14 = vld [vmem:[#allocation7 + $0x40] sm:$0xff]  ;;  %s268_s12 = scalar_lea.vmem [#allocation9], %s557_s23  ;;  %s1162_s14 = scalar_lea.hbm %s1210_s5, %s562_s9 }
  0x69   : > { %671 = vmatpush3.bf16.msra.mxu0 %v670_v4  ;;  %695 = vmatpush3.bf16.xpose.msra.mxu1 %v670_v4  ;;  %v679_v13 = vpack.c.bf16 %v278_v12, %v277_v11  ;;  %v280_v15 = vld [vmem:[#allocation7 + $0x48] sm:$0xff]  ;;  %v281_v17 = vld [vmem:[#allocation7 + $0x50] sm:$0xff]  ;;  %v282_v18 = vld [vmem:[#allocation7 + $0x58] sm:$0xff]  ;;  %s456_s6 = sshll.u32 %s268_s12, 4  ;;  %s443_s16 = scalar_lea.sflag [#allocation4], %s1132_s27  ;;  %s1164_s6 = int_to_ptr.vmem [resolvable:$true] %s456_s6 }
  0x6a   : > { %672 = vmatprep.subr.bf16.mxu0 %v945_v3  ;;  %696 = vmatprep.subr.bf16.mxu1 %v945_v3  ;;  %v682_v16 = vpack.c.bf16 %v280_v15, %v279_v14  ;;  %v685_v19 = vpack.c.bf16 %v282_v18, %v281_v17  ;;  %v283_v20 = vld [vmem:[#allocation7 + $0x60] sm:$0xff]  ;;  %v284_v21 = vld [vmem:[#allocation7 + $0x68] sm:$0xff]  ;;  %v285_v23 = vld [vmem:[#allocation7 + $0x70] sm:$0xff]  ;;  %s864_s28 = scalar_lea.vmem %s1164_s6, 128  ;;  %p1226_p13 = scmp.ne.s32.totalorder %s1219_s10, 0 }
  0x6b   : > { %v688_v22 = vpack.c.bf16 %v284_v21, %v283_v20  ;;  %v286_v24 = vld [vmem:[#allocation7 + $0x78] sm:$0xff]  ;;  %v560_v27 = vld [vmem:[%s1209_s4] ss:$0 sm:$0xff]  ;;  %p865_p10 = scmp.ne.s32.totalorder %s1164_s6, %s864_s28  ;;  %s948_s22 = smov [#allocation9]  }
  0x6c   : > { %v691_v25 = vpack.c.bf16 %v286_v24, %v285_v23  ;;  %v270_v26 = vld [vmem:[%s1138_s15] sm:$0xff]  ;;  %s868_s23 = sshll.u32 %s948_s22, 4  ;;  %s869_s23 = int_to_ptr.vmem [resolvable:$false] %s868_s23 }
  0x6d   : > { %674 = vmatpush3.bf16.msra.mxu0 %v673_v7  ;;  %v367_v33 = vld [vmem:[%s1207_s2] sm:$0xff]  ;;  %v439_v36 = vstv %s269_s8  ;;  %p866_p0 = pnand %p865_p10, %p1226_p13  ;;  %s870_s15 = scalar_lea.vmem %s869_s23, 256 }
  0x6e   : > { %675 = vmatprep.subr.bf16.mxu0 %v945_v3  ;;  %p871_p5 = scmp.lt.s32.totalorder %s1164_s6, %s869_s23  ;;  %p872_p9 = scmp.lt.s32.totalorder %s870_s15, %s864_s28 }
  0x6f   : > { %p867_p3 = pneg %p866_p0 }
  0x70   : > { %p873_p1 = por %p872_p9, %p871_p5 }
  0x71   : > { %677 = vmatpush3.bf16.msra.mxu0 %v676_v10  ;;  %698 = vmatpush3.bf16.xpose.msra.mxu1 %v673_v7 }
  0x72   : > { %678 = vmatprep.subr.bf16.mxu0 %v945_v3  ;;  %699 = vmatprep.subr.bf16.mxu1 %v945_v3  ;;  %p874_p6 = pnand %p873_p1, %p867_p3 }
  0x75   : > { %680 = vmatpush3.bf16.msra.mxu0 %v679_v13 }
  0x76   : > { %681 = vmatprep.subr.bf16.mxu0 %v945_v3 }
  0x79   : > { %683 = vmatpush3.bf16.msra.mxu0 %v682_v16  ;;  %701 = vmatpush3.bf16.xpose.msra.mxu1 %v676_v10 }
  0x7a   : > { %684 = vmatprep.subr.bf16.mxu0 %v945_v3  ;;  %702 = vmatprep.subr.bf16.mxu1 %v945_v3 }
  0x7d   : > { %686 = vmatpush3.bf16.msra.mxu0 %v685_v19 }
  0x7e   : > { %687 = vmatprep.subr.bf16.mxu0 %v945_v3 }
  0x81   : > { %689 = vmatpush3.bf16.msra.mxu0 %v688_v22  ;;  %704 = vmatpush3.bf16.xpose.msra.mxu1 %v679_v13 }
  0x82   : > { %690 = vmatprep.subr.bf16.mxu0 %v945_v3  ;;  %705 = vmatprep.subr.bf16.mxu1 %v945_v3 }
  0x85   : > { %692 = vmatpush3.bf16.msra.mxu0 %v691_v25 }
  0x88   : > { %632 = vmatmul.mubr.f32.vlgmr.msra.gmra.mrb[0].mxu0 %v270_v26 }
  0x89   : > { %707 = vmatpush3.bf16.xpose.msra.mxu1 %v682_v16 }
  0x8a   : > { %708 = vmatprep.subr.bf16.mxu1 %v945_v3 }
  0x91   : > { %710 = vmatpush3.bf16.xpose.msra.mxu1 %v685_v19 }
  0x92   : > { %711 = vmatprep.subr.bf16.mxu1 %v945_v3 }
  0x99   : > { %713 = vmatpush3.bf16.xpose.msra.mxu1 %v688_v22 }
  0x9a   : > { %714 = vmatprep.subr.bf16.mxu1 %v945_v3 }
  0xa1   : > { %716 = vmatpush3.bf16.xpose.msra.mxu1 %v691_v25 }
 0x15b   : > { %v360_v28 = vpop.f32.mrb[0].mxu0 }
 0x15c   : > { %v361_v29 = vadd.f32 %v560_v27, %v360_v28  ;;  %v633_v30 = vpop.f32.mrb[1].mxu0 }
 0x15e   : > { %789 = vtanh.f32 %v361_v29 }
 0x168   : > { %v790_v31 = vpop.eup %789 }
 0x169   : > { %v365_v32 = vmul.f32 %v790_v31, %v790_v31 }
 0x16b   : > { %v366_v34 = vsub.f32 1.0, %v365_v32 }
 0x16d   : > { %v368_v35 = vmul.f32 %v367_v33, %v366_v34 }
 0x16f   : > { %667 = vmatmul.mubr.f32.vlgmr.msra.gmra.mrb[0].mxu1 %v368_v35 }
 0x242   : > { %v435_v37 = vpop.f32.mrb[0].mxu1 }
 0x243   : > { %v440_v38 = vmul.f32 %v439_v36, %v435_v37  ;;  %v668_v39 = vpop.f32.mrb[1].mxu1 }
 0x245   : > { %441 = vst [vmem:[%s268_s12] sm:$0xff] %v440_v38 }
 0x246   : > { %877 = shalt.err (!%p874_p6)
}
 0x247   : > { %s878_s27 = scalar_lea.hbm %s1162_s14, 128  ;;  %s882_s17 = scalar_lea.hbm %s1210_s5, 2048 }
 0x248   : > { %p879_p12 = scmp.ne.s32.totalorder %s1162_s14, %s878_s27  ;;  %p883_p4 = scmp.lt.u32.totalorder %s1162_s14, %s1210_s5 }
 0x249   : > { %p884_p8 = scmp.lt.u32.totalorder %s882_s17, %s878_s27  ;;  %p886_p10 = scmp.lt.u32.totalorder %s878_s27, %s1162_s14 }
 0x24a   : > { %p880_p7 = pnand %p879_p12, %p1226_p13 }
 0x24b   : > { %p885_p2 = por %p884_p8, %p883_p4 }
 0x24c   : > { %p881_p11 = pneg %p880_p7 }
 0x24d   : > { %p887_p0 = por %p886_p10, %p885_p2 }
 0x24f   : > { %p888_p3 = pnand %p887_p0, %p881_p11 }
 0x251   : > { %891 = shalt.err (!%p888_p3)
}
 0x252   : > { %727 = dma.vmem_to_hbm [thread:$0]  (%p1226_p13), %s1164_s6, 128, %s1162_s14, %s443_s16  }
 0x253 PF: > { %p749_p5 = scmp.ge.s32.totalorder %s938_s21, 2  ;;  %s468_s9 = sand.u32 1, %s926_s18  }
 0x254   : > { %p1227_p9 = scmp.ne.s32.totalorder %s1215_s25, 0  ;;  %s469_s12 = scalar_lea.sflag [#allocation4], %s468_s9 }
 0x256   : > { %p741_p1 = pnand %p749_p5, %p1227_p9 }
 0x258   : > { %921 = dma.done.wait (!%p741_p1), %s469_s12, 128  }
 0x259   : > { %923 = vsyncadd (!%p741_p1), %s469_s12, 4294967168  ;;  %p20_p6 = scmp.ge.s32.totalorder %s1069_s30, 18   ;;  %s1228_s18 = smov %s930_s19 }
 0x25a   : > { %s1229_s19 = smov %s934_s20  ;;  %s1230_s20 = smov %s1085_s11 }
 0x25b   : > { %s1231_s21 = smov %s1069_s30  ;;  %22 = sbr.rel (!%p20_p6) target bundleno = 7 (0x7), region = 94 }
 0x262   :  { %474 = vsyncpa [#allocation3], 1 }
 0x263   :  { %476 = vsyncpa [#allocation3 + $0x1], 1 }
 0x264   :  { %477 = vsyncpa [#allocation8], 1 }
 0x265   :  { %478 = vsyncpa [#allocation4], 1 }
 0x266   :  { %480 = vsyncpa [#allocation4 + $0x1], 1 }
 0x267   :  { %481 = vsyncpa [#allocation5], 1 }
 0x268   :  { %483 = vsyncpa [#allocation5 + $0x1], 1 }

</bundles_post_ra>
